<compile_context>
chip_gen: v7x
topology: tpu7x:2x2x1
jax: 0.10.0
libtpu: 0.0.40
codegen_flags: <defaults>
</compile_context>

<pallas_src>
import functools

import jax
import jax.numpy as jnp
from jax.experimental import pallas as pl
from jax.experimental.pallas import tpu as pltpu

_LANE = 128
_SUBLANE = 8
# Per pipeline buffer budget (Pallas double-buffers each input: 2x this).
_PER_BUFFER_BUDGET = 6 * 1024 * 1024
_VMEM_LIMIT_BYTES = 32 * 1024 * 1024  # safe on v5e/v6e (128 MiB) and v7x (64 MiB)


def _mean_single_pass_kernel(x_ref, o_ref, *, inv_cols):
    """Whole reduction fits in one block: direct mean, no scratch/branches."""
    x = x_ref[...].astype(jnp.float32)
    o_ref[...] = jnp.sum(x, axis=1, keepdims=True) * inv_cols


def _mean_chunked_kernel(x_ref, o_ref, acc_ref, *, inv_cols):
    """Accumulate row-sums of column chunks; finalize with mean on last chunk."""
    j = pl.program_id(1)

    @pl.when(j == 0)
    def _init():
        acc_ref[...] = jnp.zeros_like(acc_ref)

    # Native-dtype DMA, in-kernel upcast (VPU slack), lane reduce (XLU slack).
    x = x_ref[...].astype(jnp.float32)
    acc_ref[...] += jnp.sum(x, axis=1, keepdims=True)

    @pl.when(j == pl.num_programs(1) - 1)
    def _finalize():
        o_ref[...] = acc_ref[...] * inv_cols  # 1/cols folded at trace time


def _choose_tiles(rows, cols, itemsize):
    """Largest (row_tile, col_tile) satisfying the (8,128) rules + VMEM budget."""
    # --- column (reduction) tile ---
    if cols % _LANE == 0 and _SUBLANE * cols * itemsize > _PER_BUFFER_BUDGET:
        # Split the reduction axis into lane-aligned chunks that divide cols
        # evenly (no partial reduction blocks -> no padded-garbage sums).
        n_units = cols // _LANE
        max_units = max(1, _PER_BUFFER_BUDGET // (_SUBLANE * _LANE * itemsize))
        units = min(n_units, max_units)
        while n_units % units != 0:
            units -= 1
        tc = units * _LANE
    else:
        tc = cols  # single full-width block (always layout-legal)

    # --- row tile ---
    max_rows = max(_SUBLANE,
                   (_PER_BUFFER_BUDGET // (tc * itemsize)) // _SUBLANE * _SUBLANE)
    tr = rows if rows <= max_rows else max_rows  # full rows or multiple of 8
    return tr, tc


def lambda_mean23(x):
    """Equivalent of Lambda(lambda x: x.mean(dim=[2, 3])) for NCHW input."""
    n, c, h, w = x.shape
    rows = n * c
    cols = h * w
    x2d = x.reshape(rows, cols)  # glue: reshape only, no compute

    itemsize = jnp.dtype(x.dtype).itemsize
    tr, tc = _choose_tiles(rows, cols, itemsize)
    n_row_blocks = pl.cdiv(rows, tr)
    n_col_blocks = pl.cdiv(cols, tc)

    inv_cols = 1.0 / float(cols)
    cost = pl.CostEstimate(
        flops=rows * cols,
        transcendentals=0,
        bytes_accessed=rows * cols * itemsize + rows * 4,
    )

    if n_col_blocks == 1:
        # Single-pass: reduction fits in one block -> no scratch, no branches,
        # 1-D grid, simplest codegen.
        kernel = functools.partial(_mean_single_pass_kernel, inv_cols=inv_cols)
        out2d = pl.pallas_call(
            kernel,
            out_shape=jax.ShapeDtypeStruct((rows, 1), jnp.float32),
            grid_spec=pltpu.PrefetchScalarGridSpec(
                num_scalar_prefetch=0,
                grid=(n_row_blocks,),
                in_specs=[pl.BlockSpec((tr, cols), lambda i: (i, 0))],
                out_specs=pl.BlockSpec((tr, 1), lambda i: (i, 0)),
            ),
            compiler_params=pltpu.CompilerParams(
                dimension_semantics=("parallel",),
                vmem_limit_bytes=_VMEM_LIMIT_BYTES,
            ),
            cost_estimate=cost,
        )(x2d)
    else:
        # Chunked reduction with a resident f32 accumulator (init/finalize).
        kernel = functools.partial(_mean_chunked_kernel, inv_cols=inv_cols)
        out2d = pl.pallas_call(
            kernel,
            out_shape=jax.ShapeDtypeStruct((rows, 1), jnp.float32),
            grid_spec=pltpu.PrefetchScalarGridSpec(
                num_scalar_prefetch=0,
                grid=(n_row_blocks, n_col_blocks),
                in_specs=[pl.BlockSpec((tr, tc), lambda i, j: (i, j))],
                out_specs=pl.BlockSpec((tr, 1), lambda i, j: (i, 0)),
                scratch_shapes=[pltpu.VMEM((tr, 1), jnp.float32)],
            ),
            compiler_params=pltpu.CompilerParams(
                dimension_semantics=("parallel", "arbitrary"),
                vmem_limit_bytes=_VMEM_LIMIT_BYTES,
            ),
            cost_estimate=cost,
        )(x2d)

    # torch's mean is dtype-preserving; cast the f32 result back to the input dtype.
    return out2d.reshape(n, c).astype(x.dtype)


class Lambda:
    """JAX/Pallas analogue of learn2learn.nn.Lambda (no parameters)."""

    def __init__(self, lmb):
        self.lmb = lmb

    def __call__(self, *args, **kwargs):
        return self.lmb(*args, **kwargs)


if __name__ == "__main__":
    key = jax.random.PRNGKey(0)
    # Small NCHW feature map consistent with the docstring example.
    x = jax.random.normal(key, (2, 4, 16, 16), dtype=jnp.float32)

    mean23 = Lambda(lambda t: lambda_mean23(t))  # mean23 acts like a Module
    y = mean23(x)
    y = jax.block_until_ready(y)

    # Pure-JAX reference check (same semantics as torch's mean(dim=[2, 3])).
    ref = jnp.mean(x, axis=(2, 3))
    assert y.shape == (2, 4)
    assert jnp.allclose(y, ref, atol=1e-5, rtol=1e-5)

    print("KERNEL_OK")
</pallas_src>

<mosaic_0001>
module attributes {stable_mosaic.version = 11 : i64} {
  func.func @_mean_single_pass_kernel(%arg0: i32, %arg1: memref<8x256xf32, #tpu.memory_space<vmem>>, %arg2: memref<8x1xf32, #tpu.memory_space<vmem>>) attributes {dimension_semantics = [#tpu.dimension_semantics<parallel>], iteration_bounds = array<i64: 1>, scalar_prefetch = 0 : i64, scratch_operands = 0 : i64, tpu.core_type = #tpu.core_type<tc>, window_params = [{transform_indices = @transform_0, window_bounds = array<i64: 8, 256>}, {transform_indices = @transform_1, window_bounds = array<i64: 8, 1>}]} {
    %c0 = arith.constant 0 : index
    %c0_0 = arith.constant 0 : index
    %0 = vector.load %arg1[%c0, %c0_0] : memref<8x256xf32, #tpu.memory_space<vmem>>, vector<8x256xf32>
    %cst = arith.constant dense<0.000000e+00> : vector<8xf32>
    %1 = vector.multi_reduction <add>, %0, %cst [1] : vector<8x256xf32> to vector<8xf32>
    %2 = vector.shape_cast %1 : vector<8xf32> to vector<8x1xf32>
    %cst_1 = arith.constant 3.906250e-03 : f32
    %3 = vector.broadcast %cst_1 : f32 to vector<8x1xf32>
    %4 = arith.mulf %2, %3 : vector<8x1xf32>
    %c0_2 = arith.constant 0 : index
    %c0_3 = arith.constant 0 : index
    %5 = vector.load %arg2[%c0_2, %c0_3] : memref<8x1xf32, #tpu.memory_space<vmem>>, vector<8x1xf32>
    tpu.vector_store %arg2[%c0_2, %c0_3], %4 {strides = array<i32>} : memref<8x1xf32, #tpu.memory_space<vmem>>, vector<8x1xf32>,
    return
  }
  func.func @transform_0(%arg0: i32) -> (i32, i32) {
    %c0_i32 = arith.constant 0 : i32
    %c0_i32_0 = arith.constant 0 : i32
    return %arg0, %c0_i32 : i32, i32
  }
  func.func @transform_1(%arg0: i32) -> (i32, i32) {
    %c0_i32 = arith.constant 0 : i32
    %c0_i32_0 = arith.constant 0 : i32
    return %arg0, %c0_i32 : i32, i32
  }
}

</mosaic_0001>

<bundles_post_ra>
// kernel: tpu_custom_call.1
= control target key start
LH: loop header
LB: loop body
LE: loop exit
PB: predicated region body
PF: predicated region fallthrough
CT: control target
= control target key end

     0   :  { %6 = vsyncpa [#allocation3], 0  ;;  %s58_s6 = smov [#allocation2]   ;;  %s84_s0 = inlined_call_operand.hbm [shape: f32[8,256], index: 0, kind: input, shape index: {}]   ;;  %s85_s1 = inlined_call_operand.vmem [shape: f32[8,1], index: 1, kind: output, shape index: {}]  }
   0x1   :  { %s13_s7 = sshll.u32 %s58_s6, 4  ;;  %s34_s10 = scalar_lea.hbm %s84_s0, 256  ;;  %s14_s7 = int_to_ptr.vmem [resolvable:$true] %s13_s7 }
   0x2   :  { %p35_p0 = scmp.ne.s32.totalorder %s84_s0, %s34_s10  ;;  %p38_p1 = scmp.lt.u32.totalorder %s34_s10, %s84_s0 }
   0x4   :  { %p40_p2 = pnand %p38_p1, %p35_p0 }
   0x6   :  { %43 = shalt.err (!%p40_p2)
}
   0x7   :  { %s44_s15 = scalar_lea.vmem %s14_s7, 256  ;;  %p49_p4 = scmp.lt.s32.totalorder %s14_s7, %s14_s7 }
   0x8   :  { %p45_p3 = scmp.ne.s32.totalorder %s14_s7, %s44_s15  ;;  %p50_p5 = scmp.lt.s32.totalorder %s44_s15, %s44_s15 }
   0xa   :  { %p51_p6 = por %p50_p5, %p49_p4 }
   0xc   :  { %p52_p7 = pnand %p51_p6, %p45_p3 }
   0xe   :  { %55 = shalt.err (!%p52_p7)
}
   0xf   :  { %16 = dma.hbm_to_vmem [thread:$0]  %s84_s0, 256, %s14_s7, [#allocation3]  }
  0x10   :  { %56 = dma.done.wait [#allocation3], 256  }
  0x11   :  { %57 = vsyncadd [#allocation3], 4294967040  ;;  %v20_v0 = vld [vmem:[#allocation2] sm:$0xff]  ;;  %v21_v1 = vld [vmem:[#allocation2 + $0x8] sm:$0xff]  ;;  %vm26_vm0 = vcmask 7168  }
  0x12   :  { %v22_v2 = vadd.f32 %v21_v1, %v20_v0 }
  0x14   :  { %23 = vadd.xlane.f32.xlu0 %v22_v2 }
  0xa1   :  { %v24_v3 = vpop.xlane.xlu0 %23 }
  0xa2   :  { %v25_v4 = vmul.f32 0.00390625, %v24_v3 }
  0xa4   :  { %27 = vst.msk [vmem:[%s85_s1] sm:$0xff] %vm26_vm0, %v25_v4 }
  0xa5   :  { %32 = vsyncpa [#allocation3], 1 }

</bundles_post_ra>
